<compile_context>
chip_gen: v7x
topology: tpu7x:2x2x1
jax: 0.10.0
libtpu: 0.0.40
codegen_flags: <defaults>
</compile_context>

<pallas_src>
import numpy as np

import jax
import jax.numpy as jnp
from jax.experimental import pallas as pl
from jax.experimental.pallas import tpu as pltpu


# ----------------------------------------------------------------------------
# Fused kernel: four chained matmul + bias (+ ReLU) layers, all in VMEM/vregs.
# ----------------------------------------------------------------------------
def snake_fused_kernel(x_ref, w1_ref, b1_ref, w2_ref, b2_ref,
                       w3_ref, b3_ref, w4_ref, b4_ref, o_ref):
    cdt = x_ref.dtype  # compute dtype (f32 or bf16); accumulation is always f32

    h = x_ref[...]                                                   # (Mt, 72)
    h = jnp.maximum(
        jnp.dot(h, w1_ref[...], preferred_element_type=jnp.float32) + b1_ref[...],
        0.0).astype(cdt)                                             # (Mt, 256)  conv1+relu
    h = jnp.maximum(
        jnp.dot(h, w2_ref[...], preferred_element_type=jnp.float32) + b2_ref[...],
        0.0).astype(cdt)                                             # (Mt, 128)  conv2+relu (== NCHW flatten)
    h = jnp.maximum(
        jnp.dot(h, w3_ref[...], preferred_element_type=jnp.float32) + b3_ref[...],
        0.0).astype(cdt)                                             # (Mt, 64)   fc1+relu
    # fc2 is zero-padded to 128 output lanes -> full-lane unmasked store.
    o = jnp.dot(h, w4_ref[...], preferred_element_type=jnp.float32) + b4_ref[...]
    o_ref[...] = o.astype(o_ref.dtype)                               # (Mt, 128)


# ----------------------------------------------------------------------------
# One-time weight packing: fold each valid 3x3 conv into a dense Toeplitz
# matrix that acts on the NCHW-flattened activation vector.
#   input index  p = ci*H*W + h*W + w
#   output index q = co*Ho*Wo + ho*Wo + wo      (i.e. NCHW flatten order)
# ----------------------------------------------------------------------------
def conv_toeplitz(w, H, W):
    w = np.asarray(w, dtype=np.float32)            # (Cout, Cin, KH, KW)
    Cout, Cin, KH, KW = w.shape
    Ho, Wo = H - KH + 1, W - KW + 1
    T = np.zeros((Cin, H, W, Cout, Ho, Wo), np.float32)
    for kh in range(KH):
        for kw in range(KW):
            for ho in range(Ho):
                for wo in range(Wo):
                    # T[ci, ho+kh, wo+kw, co, ho, wo] = w[co, ci, kh, kw]
                    T[:, ho + kh, wo + kw, :, ho, wo] = w[:, :, kh, kw].T
    return T.reshape(Cin * H * W, Cout * Ho * Wo)


def pack_params(params, compute_dtype=jnp.float32):
    """Pack/transpose all weights once (outside the forward pass)."""
    w1t = jnp.asarray(conv_toeplitz(params["w1"], 6, 6), compute_dtype)   # (72, 256)
    b1t = jnp.repeat(params["b1"], 4 * 4).reshape(1, 256).astype(jnp.float32)
    w2t = jnp.asarray(conv_toeplitz(params["w2"], 4, 4), compute_dtype)   # (256, 128)
    b2t = jnp.repeat(params["b2"], 2 * 2).reshape(1, 128).astype(jnp.float32)
    w3 = params["fc1_w"].T.astype(compute_dtype)                          # (128, 64)
    b3 = params["fc1_b"].reshape(1, 64).astype(jnp.float32)
    # fc2: zero-pad N from 4 -> 128 for a lane-dense output store.
    # Pad columns are exactly zero; the wrapper slices [:, :4].
    w4 = jnp.zeros((64, 128), compute_dtype).at[:, :4].set(
        params["fc2_w"].T.astype(compute_dtype))                          # (64, 128)
    b4 = jnp.zeros((1, 128), jnp.float32).at[:, :4].set(
        params["fc2_b"].reshape(1, 4).astype(jnp.float32))                # (1, 128)
    return (w1t, b1t, w2t, b2t, w3, b3, w4, b4)


def default_compute_dtype():
    """bf16 on bf16-native chips (v6e / v7x), f32 otherwise (incl. v5e)."""
    try:
        kind = jax.devices()[0].device_kind.lower()
    except Exception:
        return jnp.float32
    if ("v6" in kind) or ("v7" in kind):
        return jnp.bfloat16
    return jnp.float32


# ----------------------------------------------------------------------------
# Forward pass
# ----------------------------------------------------------------------------
def _cdiv(a, b):
    return -(-a // b)


def _round_up(a, b):
    return _cdiv(a, b) * b


def snake_brain_forward(x, packed, *, block_m=1024):
    """x: NCHW (B, 2, 6, 6). Returns (B, 4)."""
    B = x.shape[0]
    cdt = packed[0].dtype  # compute dtype encoded in the packed weights

    # NCHW flatten of the input (matches the Toeplitz input index order).
    xf = x.reshape(B, 2 * 6 * 6).astype(cdt)                          # (B, 72)

    # Tile selection: minimal padding (<= ~8 rows per tile) and, when more
    # than one tile is needed, an even tile count so v7x's two TensorCores
    # split the "parallel" batch axis evenly.
    n_tiles = _cdiv(B, block_m)
    if n_tiles > 1 and n_tiles % 2 == 1:
        n_tiles += 1
    mt = _round_up(_cdiv(B, n_tiles), 8)
    m_pad = n_tiles * mt
    if m_pad != B:
        xf = jnp.pad(xf, ((0, m_pad - B), (0, 0)))
    grid = (n_tiles,)

    const = lambda i: (0, 0)   # weights/biases: resident across batch tiles

    out = pl.pallas_call(
        snake_fused_kernel,
        out_shape=jax.ShapeDtypeStruct((m_pad, 128), jnp.float32),
        grid=grid,
        in_specs=[
            pl.BlockSpec((mt, 72), lambda i: (i, 0)),     # x tile
            pl.BlockSpec((72, 256), const),               # conv1 (Toeplitz)
            pl.BlockSpec((1, 256), const),
            pl.BlockSpec((256, 128), const),              # conv2 (Toeplitz)
            pl.BlockSpec((1, 128), const),
            pl.BlockSpec((128, 64), const),               # fc1
            pl.BlockSpec((1, 64), const),
            pl.BlockSpec((64, 128), const),               # fc2 (zero-padded to 128 lanes)
            pl.BlockSpec((1, 128), const),
        ],
        out_specs=pl.BlockSpec((mt, 128), lambda i: (i, 0)),
        compiler_params=pltpu.CompilerParams(
            dimension_semantics=("parallel",)),           # shards over 2 TCs on v7x
    )(xf, *packed)
    return out[:B, :4]


# ----------------------------------------------------------------------------
# Deterministic parameter init (shapes follow the PyTorch module __init__)
# ----------------------------------------------------------------------------
def init_params(key):
    ks = jax.random.split(key, 8)
    scale = 0.1
    return {
        "w1":    scale * jax.random.normal(ks[0], (16, 2, 3, 3), jnp.float32),
        "b1":    scale * jax.random.normal(ks[1], (16,), jnp.float32),
        "w2":    scale * jax.random.normal(ks[2], (32, 16, 3, 3), jnp.float32),
        "b2":    scale * jax.random.normal(ks[3], (32,), jnp.float32),
        "fc1_w": scale * jax.random.normal(ks[4], (64, 128), jnp.float32),
        "fc1_b": scale * jax.random.normal(ks[5], (64,), jnp.float32),
        "fc2_w": scale * jax.random.normal(ks[6], (4, 64), jnp.float32),
        "fc2_b": scale * jax.random.normal(ks[7], (4,), jnp.float32),
    }


# Pure-JAX reference (mirrors the PyTorch forward) for a sanity check.
def reference_forward(x, params):
    dn = ("NCHW", "OIHW", "NCHW")
    y = jax.lax.conv_general_dilated(x, params["w1"], (1, 1), "VALID",
                                     dimension_numbers=dn)
    y = jnp.maximum(y + params["b1"][None, :, None, None], 0.0)
    y = jax.lax.conv_general_dilated(y, params["w2"], (1, 1), "VALID",
                                     dimension_numbers=dn)
    y = jnp.maximum(y + params["b2"][None, :, None, None], 0.0)
    y = y.reshape(y.shape[0], -1)                         # NCHW flatten, like x.view(-1, 128)
    y = jnp.maximum(y @ params["fc1_w"].T + params["fc1_b"], 0.0)
    return y @ params["fc2_w"].T + params["fc2_b"]


if __name__ == "__main__":
    key = jax.random.PRNGKey(0)
    pkey, xkey = jax.random.split(key)
    params = init_params(pkey)

    cdt = default_compute_dtype()                         # bf16 on v6e/v7x, f32 on v5e
    packed = pack_params(params, compute_dtype=cdt)       # one-time weight packing

    # Input: NCHW (batch=2, channels=2, 6x6) — 6x6 is implied by fc1 = 32*2*2.
    x = jax.random.normal(xkey, (2, 2, 6, 6), jnp.float32)

    out = jax.jit(snake_brain_forward)(x, packed)
    out = jax.block_until_ready(out)
    assert out.shape == (2, 4), out.shape

    # Sanity check against the plain-JAX reference of the PyTorch forward.
    ref = jax.block_until_ready(reference_forward(x, params))
    tol = 1e-3 if cdt == jnp.float32 else 5e-2            # bf16 activations/weights
    assert jnp.allclose(out, ref, atol=tol, rtol=tol), (out, ref)

    print("KERNEL_OK")
</pallas_src>

<mosaic_0001>
module attributes {stable_mosaic.version = 11 : i64} {
  func.func @snake_fused_kernel(%arg0: i32, %arg1: memref<8x72xf32, #tpu.memory_space<vmem>>, %arg2: memref<72x256xf32, #tpu.memory_space<vmem>>, %arg3: memref<1x256xf32, #tpu.memory_space<vmem>>, %arg4: memref<256x128xf32, #tpu.memory_space<vmem>>, %arg5: memref<1x128xf32, #tpu.memory_space<vmem>>, %arg6: memref<128x64xf32, #tpu.memory_space<vmem>>, %arg7: memref<1x64xf32, #tpu.memory_space<vmem>>, %arg8: memref<64x128xf32, #tpu.memory_space<vmem>>, %arg9: memref<1x128xf32, #tpu.memory_space<vmem>>, %arg10: memref<8x128xf32, #tpu.memory_space<vmem>>) attributes {dimension_semantics = [#tpu.dimension_semantics<parallel>], iteration_bounds = array<i64: 1>, scalar_prefetch = 0 : i64, scratch_operands = 0 : i64, tpu.core_type = #tpu.core_type<tc>, window_params = [{transform_indices = @transform_0, window_bounds = array<i64: 8, 72>}, {pipeline_mode = #tpu.pipeline_mode<synchronous>, transform_indices = @transform_1, window_bounds = array<i64: 72, 256>}, {pipeline_mode = #tpu.pipeline_mode<synchronous>, transform_indices = @transform_2, window_bounds = array<i64: 1, 256>}, {pipeline_mode = #tpu.pipeline_mode<synchronous>, transform_indices = @transform_3, window_bounds = array<i64: 256, 128>}, {pipeline_mode = #tpu.pipeline_mode<synchronous>, transform_indices = @transform_4, window_bounds = array<i64: 1, 128>}, {pipeline_mode = #tpu.pipeline_mode<synchronous>, transform_indices = @transform_5, window_bounds = array<i64: 128, 64>}, {pipeline_mode = #tpu.pipeline_mode<synchronous>, transform_indices = @transform_6, window_bounds = array<i64: 1, 64>}, {pipeline_mode = #tpu.pipeline_mode<synchronous>, transform_indices = @transform_7, window_bounds = array<i64: 64, 128>}, {pipeline_mode = #tpu.pipeline_mode<synchronous>, transform_indices = @transform_8, window_bounds = array<i64: 1, 128>}, {transform_indices = @transform_9, window_bounds = array<i64: 8, 128>}]} {
    %c0 = arith.constant 0 : index
    %c0_0 = arith.constant 0 : index
    %0 = vector.load %arg1[%c0, %c0_0] : memref<8x72xf32, #tpu.memory_space<vmem>>, vector<8x72xf32>
    %c0_1 = arith.constant 0 : index
    %c0_2 = arith.constant 0 : index
    %1 = vector.load %arg2[%c0_1, %c0_2] : memref<72x256xf32, #tpu.memory_space<vmem>>, vector<72x256xf32>
    %cst = arith.constant dense<0.000000e+00> : vector<8x256xf32>
    %2 = tpu.matmul %0, %1, %cst {dimension_numbers = #tpu.dot_dimension_numbers<[1], [0], [0], [1], [0, 0, 1, 1], [], []>} : vector<8x72xf32>, vector<72x256xf32>, vector<8x256xf32> -> vector<8x256xf32>
    %c0_3 = arith.constant 0 : index
    %c0_4 = arith.constant 0 : index
    %3 = vector.load %arg3[%c0_3, %c0_4] : memref<1x256xf32, #tpu.memory_space<vmem>>, vector<1x256xf32>
    %4 = vector.broadcast %3 : vector<1x256xf32> to vector<8x256xf32>
    %5 = arith.addf %2, %4 : vector<8x256xf32>
    %cst_5 = arith.constant 0.000000e+00 : f32
    %6 = vector.broadcast %cst_5 : f32 to vector<8x256xf32>
    %7 = arith.maximumf %5, %6 : vector<8x256xf32>
    %c0_6 = arith.constant 0 : index
    %c0_7 = arith.constant 0 : index
    %8 = vector.load %arg4[%c0_6, %c0_7] : memref<256x128xf32, #tpu.memory_space<vmem>>, vector<256x128xf32>
    %cst_8 = arith.constant dense<0.000000e+00> : vector<8x128xf32>
    %9 = tpu.matmul %7, %8, %cst_8 {dimension_numbers = #tpu.dot_dimension_numbers<[1], [0], [0], [1], [0, 0, 1, 1], [], []>} : vector<8x256xf32>, vector<256x128xf32>, vector<8x128xf32> -> vector<8x128xf32>
    %c0_9 = arith.constant 0 : index
    %c0_10 = arith.constant 0 : index
    %10 = vector.load %arg5[%c0_9, %c0_10] : memref<1x128xf32, #tpu.memory_space<vmem>>, vector<1x128xf32>
    %11 = vector.broadcast %10 : vector<1x128xf32> to vector<8x128xf32>
    %12 = arith.addf %9, %11 : vector<8x128xf32>
    %cst_11 = arith.constant 0.000000e+00 : f32
    %13 = vector.broadcast %cst_11 : f32 to vector<8x128xf32>
    %14 = arith.maximumf %12, %13 : vector<8x128xf32>
    %c0_12 = arith.constant 0 : index
    %c0_13 = arith.constant 0 : index
    %15 = vector.load %arg6[%c0_12, %c0_13] : memref<128x64xf32, #tpu.memory_space<vmem>>, vector<128x64xf32>
    %cst_14 = arith.constant dense<0.000000e+00> : vector<8x64xf32>
    %16 = tpu.matmul %14, %15, %cst_14 {dimension_numbers = #tpu.dot_dimension_numbers<[1], [0], [0], [1], [0, 0, 1, 1], [], []>} : vector<8x128xf32>, vector<128x64xf32>, vector<8x64xf32> -> vector<8x64xf32>
    %c0_15 = arith.constant 0 : index
    %c0_16 = arith.constant 0 : index
    %17 = vector.load %arg7[%c0_15, %c0_16] : memref<1x64xf32, #tpu.memory_space<vmem>>, vector<1x64xf32>
    %18 = vector.broadcast %17 : vector<1x64xf32> to vector<8x64xf32>
    %19 = arith.addf %16, %18 : vector<8x64xf32>
    %cst_17 = arith.constant 0.000000e+00 : f32
    %20 = vector.broadcast %cst_17 : f32 to vector<8x64xf32>
    %21 = arith.maximumf %19, %20 : vector<8x64xf32>
    %c0_18 = arith.constant 0 : index
    %c0_19 = arith.constant 0 : index
    %22 = vector.load %arg8[%c0_18, %c0_19] : memref<64x128xf32, #tpu.memory_space<vmem>>, vector<64x128xf32>
    %cst_20 = arith.constant dense<0.000000e+00> : vector<8x128xf32>
    %23 = tpu.matmul %21, %22, %cst_20 {dimension_numbers = #tpu.dot_dimension_numbers<[1], [0], [0], [1], [0, 0, 1, 1], [], []>} : vector<8x64xf32>, vector<64x128xf32>, vector<8x128xf32> -> vector<8x128xf32>
    %c0_21 = arith.constant 0 : index
    %c0_22 = arith.constant 0 : index
    %24 = vector.load %arg9[%c0_21, %c0_22] : memref<1x128xf32, #tpu.memory_space<vmem>>, vector<1x128xf32>
    %25 = vector.broadcast %24 : vector<1x128xf32> to vector<8x128xf32>
    %26 = arith.addf %23, %25 : vector<8x128xf32>
    %c0_23 = arith.constant 0 : index
    %c0_24 = arith.constant 0 : index
    %27 = vector.load %arg10[%c0_23, %c0_24] : memref<8x128xf32, #tpu.memory_space<vmem>>, vector<8x128xf32>
    tpu.vector_store %arg10[%c0_23, %c0_24], %26 {strides = array<i32>} : memref<8x128xf32, #tpu.memory_space<vmem>>, vector<8x128xf32>,
    return
  }
  func.func @transform_0(%arg0: i32) -> (i32, i32) {
    %c0_i32 = arith.constant 0 : i32
    %c0_i32_0 = arith.constant 0 : i32
    return %arg0, %c0_i32 : i32, i32
  }
  func.func @transform_1(%arg0: i32) -> (i32, i32) {
    %c0_i32 = arith.constant 0 : i32
    %c0_i32_0 = arith.constant 0 : i32
    %c0_i32_1 = arith.constant 0 : i32
    return %c0_i32, %c0_i32_0 : i32, i32
  }
  func.func @transform_2(%arg0: i32) -> (i32, i32) {
    %c0_i32 = arith.constant 0 : i32
    %c0_i32_0 = arith.constant 0 : i32
    %c0_i32_1 = arith.constant 0 : i32
    return %c0_i32, %c0_i32_0 : i32, i32
  }
  func.func @transform_3(%arg0: i32) -> (i32, i32) {
    %c0_i32 = arith.constant 0 : i32
    %c0_i32_0 = arith.constant 0 : i32
    %c0_i32_1 = arith.constant 0 : i32
    return %c0_i32, %c0_i32_0 : i32, i32
  }
  func.func @transform_4(%arg0: i32) -> (i32, i32) {
    %c0_i32 = arith.constant 0 : i32
    %c0_i32_0 = arith.constant 0 : i32
    %c0_i32_1 = arith.constant 0 : i32
    return %c0_i32, %c0_i32_0 : i32, i32
  }
  func.func @transform_5(%arg0: i32) -> (i32, i32) {
    %c0_i32 = arith.constant 0 : i32
    %c0_i32_0 = arith.constant 0 : i32
    %c0_i32_1 = arith.constant 0 : i32
    return %c0_i32, %c0_i32_0 : i32, i32
  }
  func.func @transform_6(%arg0: i32) -> (i32, i32) {
    %c0_i32 = arith.constant 0 : i32
    %c0_i32_0 = arith.constant 0 : i32
    %c0_i32_1 = arith.constant 0 : i32
    return %c0_i32, %c0_i32_0 : i32, i32
  }
  func.func @transform_7(%arg0: i32) -> (i32, i32) {
    %c0_i32 = arith.constant 0 : i32
    %c0_i32_0 = arith.constant 0 : i32
    %c0_i32_1 = arith.constant 0 : i32
    return %c0_i32, %c0_i32_0 : i32, i32
  }
  func.func @transform_8(%arg0: i32) -> (i32, i32) {
    %c0_i32 = arith.constant 0 : i32
    %c0_i32_0 = arith.constant 0 : i32
    %c0_i32_1 = arith.constant 0 : i32
    return %c0_i32, %c0_i32_0 : i32, i32
  }
  func.func @transform_9(%arg0: i32) -> (i32, i32) {
    %c0_i32 = arith.constant 0 : i32
    %c0_i32_0 = arith.constant 0 : i32
    return %arg0, %c0_i32 : i32, i32
  }
}

</mosaic_0001>

<bundles_post_ra>
// kernel: snake_brain_forward.1
= control target key start
LH: loop header
LB: loop body
LE: loop exit
PB: predicated region body
PF: predicated region fallthrough
CT: control target
= control target key end

     0   :  { %14 = vsyncpa [#allocation3], 0  ;;  %s989_s0 = inlined_call_operand.vmem [shape: f32[8,72], index: 0, kind: input, shape index: {}]   ;;  %s990_s1 = inlined_call_operand.hbm [shape: f32[72,256], index: 1, kind: input, shape index: {}]   ;;  %s991_s2 = inlined_call_operand.vmem [shape: f32[1,256], index: 2, kind: input, shape index: {}]   ;;  %s992_s3 = inlined_call_operand.vmem [shape: f32[256,128], index: 3, kind: input, shape index: {}]   ;;  %s993_s4 = inlined_call_operand.vmem [shape: f32[1,128], index: 4, kind: input, shape index: {}]   ;;  %s994_s5 = inlined_call_operand.vmem [shape: f32[128,64], index: 5, kind: input, shape index: {}]   ;;  %s995_s6 = inlined_call_operand.vmem [shape: f32[1,64], index: 6, kind: input, shape index: {}]   ;;  %s996_s7 = inlined_call_operand.hbm [shape: f32[64,128], index: 7, kind: input, shape index: {}]   ;;  %s997_s8 = inlined_call_operand.vmem [shape: f32[1,128], index: 8, kind: input, shape index: {}]   ;;  %s998_s9 = inlined_call_operand.vmem [shape: f32[8,128], index: 9, kind: output, shape index: {}]  }
   0x1   :  { %15 = vsyncpa [#allocation5], 0  ;;  %s729_s30 = smov [#allocation2]   ;;  %s681_s13 = scalar_lea.hbm %s990_s1, 2304 }
   0x2   :  { %s23_s10 = sshll.u32 %s729_s30, 4  ;;  %p682_p0 = scmp.ne.s32.totalorder %s990_s1, %s681_s13  ;;  %s24_s10 = int_to_ptr.vmem [resolvable:$true] %s23_s10 }
   0x3   :  { %p685_p1 = scmp.lt.u32.totalorder %s681_s13, %s990_s1 }
   0x5   :  { %p687_p2 = pnand %p685_p1, %p682_p0 }
   0x7   :  { %690 = shalt.err (!%p687_p2)
}
   0x8   :  { %s691_s18 = scalar_lea.vmem %s24_s10, 2304  ;;  %p696_p4 = scmp.lt.s32.totalorder %s24_s10, %s24_s10 }
   0x9   :  { %p692_p3 = scmp.ne.s32.totalorder %s24_s10, %s691_s18  ;;  %p697_p5 = scmp.lt.s32.totalorder %s691_s18, %s691_s18 }
   0xb   :  { %p698_p6 = por %p697_p5, %p696_p4 }
   0xd   :  { %p699_p7 = pnand %p698_p6, %p692_p3 }
   0xf   :  { %702 = shalt.err (!%p699_p7)
}
  0x10   :  { %s730_s19 = smov 256   ;;  %s731_s20 = smov 16  }
  0x11   :  { %29 = dma.hbm_to_vmem [thread:$0]  %s990_s1, 2304, %s24_s10, [#allocation3], %s730_s19, %s730_s19, %s731_s20  }
  0x12   :  { %s732_s23 = smov [#allocation4]   ;;  %s703_s27 = scalar_lea.hbm %s996_s7, 1024 }
  0x13   :  { %s45_s24 = sshll.u32 %s732_s23, 4  ;;  %p704_p8 = scmp.ne.s32.totalorder %s996_s7, %s703_s27  ;;  %s46_s24 = int_to_ptr.vmem [resolvable:$true] %s45_s24 }
  0x14   :  { %p707_p9 = scmp.lt.u32.totalorder %s703_s27, %s996_s7 }
  0x16   :  { %p709_p10 = pnand %p707_p9, %p704_p8 }
  0x18   :  { %712 = shalt.err (!%p709_p10)
}
  0x19   :  { %s713_s12 = scalar_lea.vmem %s46_s24, 1024  ;;  %p718_p12 = scmp.lt.s32.totalorder %s46_s24, %s46_s24 }
  0x1a   :  { %p714_p11 = scmp.ne.s32.totalorder %s46_s24, %s713_s12  ;;  %p719_p13 = scmp.lt.s32.totalorder %s713_s12, %s713_s12 }
  0x1c   :  { %p720_p0 = por %p719_p13, %p718_p12 }
  0x1e   :  { %p721_p1 = pnand %p720_p0, %p714_p11 }
  0x20   :  { %724 = shalt.err (!%p721_p1)
}
  0x21   :  { %s733_s1 = smov 128   ;;  %s734_s10 = smov 8  }
  0x22   :  { %51 = dma.hbm_to_vmem [thread:$0]  %s996_s7, 1024, %s46_s24, [#allocation5], %s733_s1, %s733_s1, %s734_s10  }
  0x23   :  { %725 = dma.done.wait [#allocation3], 2304  }
  0x24   :  { %726 = vsyncadd [#allocation3], 4294964992 }
  0x25   :  { %727 = dma.done.wait [#allocation5], 1024  }
  0x26   :  { %728 = vsyncadd [#allocation5], 4294966272  ;;  %v735_v0 = vmov 0.0   ;;  %v62_v1 = vld [vmem:[#allocation2 + $0x8] sm:$0xff]  ;;  %v64_v2 = vld [vmem:[#allocation2 + $0x18] sm:$0xff]  ;;  %vm91_vm0 = vcmask 588800  }
  0x27   :  { %159 = vmatprep.mubr.f32.mxu0 %v735_v0  ;;  %v61_v3 = vld [vmem:[#allocation2] sm:$0xff]  ;;  %v588_v4 = vpack.c.bf16 %v64_v2, %v62_v1  ;;  %v63_v5 = vld [vmem:[#allocation2 + $0x10] sm:$0xff]  ;;  %v66_v6 = vld [vmem:[#allocation2 + $0x28] sm:$0xff]  ;;  %vm737_vm1 = vmmov 0   ;;  %vm387_vm2 = vcmask 523264  }
  0x28   :  { %v68_v7 = vld [vmem:[#allocation2 + $0x38] sm:$0xff]  ;;  %v590_v8 = vpack.c.bf16 %v63_v5, %v61_v3  ;;  %v65_v10 = vld [vmem:[#allocation2 + $0x20] sm:$0xff]  ;;  %v67_v11 = vld [vmem:[#allocation2 + $0x30] sm:$0xff] }
  0x29   :  { %v592_v9 = vpack.c.bf16 %v68_v7, %v66_v6  ;;  %v70_v12 = vld [vmem:[#allocation2 + $0x48] sm:$0xff]  ;;  %589 = vmatprep.subr.bf16.mxu0 %v588_v4  ;;  %v72_v13 = vld [vmem:[#allocation2 + $0x58] sm:$0xff]  ;;  %v594_v14 = vpack.c.bf16 %v67_v11, %v65_v10  ;;  %v69_v16 = vld [vmem:[#allocation2 + $0x40] sm:$0xff] }
  0x2a   :  { %591 = vmatpush1.bf16.msra.mxu0 %v590_v8  ;;  %v596_v15 = vpack.c.bf16 %v72_v13, %v70_v12  ;;  %v71_v17 = vld [vmem:[#allocation2 + $0x50] sm:$0xff]  ;;  %v74_v18 = vld [vmem:[#allocation2 + $0x68] sm:$0xff]  ;;  %v76_v19 = vld [vmem:[#allocation2 + $0x78] sm:$0xff] }
  0x2b   :  { %593 = vmatprep.subr.bf16.mxu0 %v592_v9  ;;  %v184_v20 = vld [vmem:[%s992_s3 + $0x80] sm:$0xff]  ;;  %v185_v21 = vld [vmem:[%s992_s3 + $0x88] sm:$0xff]  ;;  %v186_v26 = vld [vmem:[%s992_s3 + $0x90] sm:$0xff]  ;;  %v598_v27 = vpack.c.bf16 %v71_v17, %v69_v16  ;;  %v600_v32 = vpack.c.bf16 %v76_v19, %v74_v18  ;;  %v736_v16 = vmov 0.0|0.0  }
  0x2c   :  { %v73_v22 = vld [vmem:[#allocation2 + $0x60] sm:$0xff]  ;;  %v604_v23 = vpack.c.bf16 %v185_v21, %v184_v20  ;;  %v169_v25 = vld [vmem:[%s992_s3 + $0x8] sm:$0xff]  ;;  %v187_v29 = vld [vmem:[%s992_s3 + $0x98] sm:$0xff] }
  0x2d   :  { %v168_v24 = vld [vmem:[%s992_s3] sm:$0xff]  ;;  %v170_v30 = vld [vmem:[%s992_s3 + $0x10] sm:$0xff]  ;;  %v171_v31 = vld [vmem:[%s992_s3 + $0x18] sm:$0xff]  ;;  %v608_v34 = vpack.c.bf16 %v187_v29, %v186_v26 }
  0x2e   :  { %595 = vmatpush1.bf16.msra.mxu0 %v594_v14  ;;  %v606_v28 = vpack.c.bf16 %v169_v25, %v168_v24  ;;  %v75_v33 = vld [vmem:[#allocation2 + $0x70] sm:$0xff]  ;;  %605 = vmatprep.subr.bf16.mxu1 %v604_v23  ;;  %v188_v35 = vld [vmem:[%s992_s3 + $0xa0] sm:$0xff]  ;;  %v189_v36 = vld [vmem:[%s992_s3 + $0xa8] sm:$0xff]  ;;  %v610_v37 = vpack.c.bf16 %v171_v31, %v170_v30 }
  0x2f   :  { %597 = vmatprep.subr.bf16.mxu0 %v596_v15  ;;  %v612_v38 = vpack.c.bf16 %v189_v36, %v188_v35  ;;  %v172_v39 = vld [vmem:[%s992_s3 + $0x20] sm:$0xff]  ;;  %v173_v40 = vld [vmem:[%s992_s3 + $0x28] sm:$0xff]  ;;  %v602_v41 = vpack.c.bf16 %v75_v33, %v73_v22  ;;  %v190_v42 = vld [vmem:[%s992_s3 + $0xb0] sm:$0xff] }
  0x30   :  { %607 = vmatpush3.bf16.msra.mxu1 %v606_v28  ;;  %v191_v43 = vld [vmem:[%s992_s3 + $0xb8] sm:$0xff]  ;;  %v78_v44 = vld [vmem:[#allocation2 + $0x88] sm:$0xff]  ;;  %v614_v45 = vpack.c.bf16 %v173_v40, %v172_v39  ;;  %v174_v47 = vld [vmem:[%s992_s3 + $0x30] sm:$0xff] }
  0x31   :  { %609 = vmatprep.subr.bf16.mxu1 %v608_v34  ;;  %v616_v46 = vpack.c.bf16 %v191_v43, %v190_v42  ;;  %v175_v48 = vld [vmem:[%s992_s3 + $0x38] sm:$0xff]  ;;  %v192_v49 = vld [vmem:[%s992_s3 + $0xc0] sm:$0xff]  ;;  %v193_v50 = vld [vmem:[%s992_s3 + $0xc8] sm:$0xff] }
  0x32   :  { %599 = vmatpush1.bf16.msra.mxu0 %v598_v27  ;;  %v77_v51 = vld [vmem:[#allocation2 + $0x80] sm:$0xff]  ;;  %v618_v53 = vpack.c.bf16 %v175_v48, %v174_v47  ;;  %v620_v54 = vpack.c.bf16 %v193_v50, %v192_v49  ;;  %v177_v56 = vld [vmem:[%s992_s3 + $0x48] sm:$0xff]  ;;  %v194_v57 = vld [vmem:[%s992_s3 + $0xd0] sm:$0xff] }
  0x33   :  { %601 = vmatprep.subr.bf16.mxu0 %v600_v32  ;;  %v60_v52 = vld [vmem:[%s989_s0] sm:$0xff]  ;;  %v195_v58 = vld [vmem:[%s992_s3 + $0xd8] sm:$0xff]  ;;  %v178_v61 = vld [vmem:[%s992_s3 + $0x50] sm:$0xff]  ;;  %v81_v32 = vlaneseq }
  0x34   :  { %611 = vmatpush3.bf16.msra.mxu1 %v610_v37  ;;  %v176_v55 = vld [vmem:[%s992_s3 + $0x40] sm:$0xff]  ;;  %v624_v60 = vpack.c.bf16 %v195_v58, %v194_v57  ;;  %v179_v62 = vld [vmem:[%s992_s3 + $0x58] sm:$0xff]  ;;  %v197_v1 = vld [vmem:[%s992_s3 + $0xe8] sm:$0xff] }
  0x35   :  { %613 = vmatprep.subr.bf16.mxu1 %v612_v38  ;;  %v622_v59 = vpack.c.bf16 %v177_v56, %v176_v55  ;;  %v196_v63 = vld [vmem:[%s992_s3 + $0xe0] sm:$0xff]  ;;  %v626_v2 = vpack.c.bf16 %v179_v62, %v178_v61  ;;  %v181_v5 = vld [vmem:[%s992_s3 + $0x68] sm:$0xff]  ;;  %v198_v7 = vld [vmem:[%s992_s3 + $0xf0] sm:$0xff]  ;;  %v82_v33 = vshrl.u32 %v81_v32, 7 }
  0x36   :  { %603 = vmatpush1.bf16.msra.mxu0 %v602_v41  ;;  %v628_v3 = vpack.c.bf16 %v197_v1, %v196_v63  ;;  %v180_v4 = vld [vmem:[%s992_s3 + $0x60] sm:$0xff]  ;;  %v199_v8 = vld [vmem:[%s992_s3 + $0xf8] sm:$0xff]  ;;  %v182_v10 = vld [vmem:[%s992_s3 + $0x70] sm:$0xff] }
  0x37   :  { %111 = vmatprep.subr.mxu0 %v78_v44  ;;  %v630_v6 = vpack.c.bf16 %v181_v5, %v180_v4  ;;  %v632_v9 = vpack.c.bf16 %v199_v8, %v198_v7  ;;  %v183_v11 = vld [vmem:[%s992_s3 + $0x78] sm:$0xff]  ;;  %v278_v13 = vld [vmem:[%s994_s5] sm:$0xff]  ;;  %v279_v14 = vld [vmem:[%s994_s5 + $0x8] sm:$0xff]  ;;  %v83_v34 = vsub.s32 0, %v82_v33  ;;  %v87_v36 = vsub.s32 1, %v82_v33 }
  0x38   :  { %615 = vmatpush3.bf16.msra.mxu1 %v614_v45  ;;  %v634_v12 = vpack.c.bf16 %v183_v11, %v182_v10  ;;  %v280_v15 = vld [vmem:[%s994_s5 + $0x10] sm:$0xff]  ;;  %v637_v17 = vpack.c.bf16 %v279_v14, %v278_v13  ;;  %v281_v18 = vld [vmem:[%s994_s5 + $0x18] sm:$0xff]  ;;  %v282_v20 = vld [vmem:[%s994_s5 + $0x20] sm:$0xff] }
  0x39   :  { %617 = vmatprep.subr.bf16.mxu1 %v616_v46  ;;  %v640_v19 = vpack.c.bf16 %v281_v18, %v280_v15  ;;  %v283_v21 = vld [vmem:[%s994_s5 + $0x28] sm:$0xff]  ;;  %v284_v23 = vld [vmem:[%s994_s5 + $0x30] sm:$0xff]  ;;  %v285_v24 = vld [vmem:[%s994_s5 + $0x38] sm:$0xff] }
  0x3a   :  { %112 = vmatpush1.msra.mxu0 %v77_v51  ;;  %v643_v22 = vpack.c.bf16 %v283_v21, %v282_v20  ;;  %v646_v25 = vpack.c.bf16 %v285_v24, %v284_v23  ;;  %v286_v26 = vld [vmem:[%s994_s5 + $0x40] sm:$0xff]  ;;  %v287_v27 = vld [vmem:[%s994_s5 + $0x48] sm:$0xff]  ;;  %v288_v29 = vld [vmem:[%s994_s5 + $0x50] sm:$0xff] }
  0x3b   :  { %468 = vmatmul.mubr.msk.f32.vlgmr.msra.gmra.mrb[0].mxu0 %vm91_vm0, %v60_v52  ;;  %636 = vmatprep.subr.bf16.mxu0 %v736_v16  ;;  %v649_v28 = vpack.c.bf16 %v287_v27, %v286_v26  ;;  %v289_v30 = vld [vmem:[%s994_s5 + $0x58] sm:$0xff]  ;;  %v79_v35 = vld [vmem:[%s991_s2] sm:$0x3]  ;;  %v291_v46 = vld [vmem:[%s994_s5 + $0x68] sm:$0xff] }
  0x3c   :  { %619 = vmatpush3.bf16.msra.mxu1 %v618_v53  ;;  %638 = vmatpush3.bf16.msra.mxu0 %v637_v17  ;;  %v652_v31 = vpack.c.bf16 %v289_v30, %v288_v29  ;;  %v84_v37 = vrot.slane %v79_v35, %v83_v34  ;;  %v88_v38 = vrot.slane %v79_v35, %v87_v36  ;;  %v290_v45 = vld [vmem:[%s994_s5 + $0x60] sm:$0xff]  ;;  %v292_v48 = vld [vmem:[%s994_s5 + $0x70] sm:$0xff]  ;;  %v293_v49 = vld [vmem:[%s994_s5 + $0x78] sm:$0xff] }
  0x3d   :  { %621 = vmatprep.subr.bf16.mxu1 %v620_v54  ;;  %639 = vmatprep.subr.bf16.mxu0 %v736_v16  ;;  %v655_v47 = vpack.c.bf16 %v291_v46, %v290_v45  ;;  %v658_v50 = vpack.c.bf16 %v293_v49, %v292_v48  ;;  %v372_v51 = vld [vmem:[#allocation4] sm:$0xff]  ;;  %v373_v52 = vld [vmem:[#allocation4 + $0x8] sm:$0xff]  ;;  %v374_v53 = vld [vmem:[#allocation4 + $0x10] sm:$0xff] }
  0x3e   :  { %566 = vmatprep.mubr.msk.f32.mxu0 %vm737_vm1, %v735_v0  ;;  %v661_v54 = vpack.c.bf16 %v373_v52, %v372_v51  ;;  %v375_v55 = vld [vmem:[#allocation4 + $0x18] sm:$0xff]  ;;  %v376_v57 = vld [vmem:[#allocation4 + $0x20] sm:$0xff]  ;;  %v377_v58 = vld [vmem:[#allocation4 + $0x28] sm:$0xff] }
  0x3f   :  { %v664_v56 = vpack.c.bf16 %v375_v55, %v374_v53  ;;  %v470_v5 = vld [vmem:[%s995_s6] ss:$0 sm:$0xff] }
  0x40   :  { %623 = vmatpush3.bf16.msra.mxu1 %v622_v59  ;;  %641 = vmatpush3.bf16.msra.mxu0 %v640_v19  ;;  %v667_v59 = vpack.c.bf16 %v377_v58, %v376_v57  ;;  %v471_v10 = vld [vmem:[%s997_s8] ss:$0 sm:$0xff] }
  0x41   :  { %625 = vmatprep.subr.bf16.mxu1 %v624_v60  ;;  %642 = vmatprep.subr.bf16.mxu0 %v736_v16 }
  0x44   :  { %627 = vmatpush3.bf16.msra.mxu1 %v626_v2  ;;  %644 = vmatpush3.bf16.msra.mxu0 %v643_v22  ;;  %v378_v2 = vld [vmem:[#allocation4 + $0x30] sm:$0xff] }
  0x45   :  { %629 = vmatprep.subr.bf16.mxu1 %v628_v3  ;;  %645 = vmatprep.subr.bf16.mxu0 %v736_v16  ;;  %v379_v3 = vld [vmem:[#allocation4 + $0x38] sm:$0xff] }
  0x46   :  { %v670_v4 = vpack.c.bf16 %v379_v3, %v378_v2 }
  0x48   :  { %631 = vmatpush3.bf16.msra.mxu1 %v630_v6  ;;  %647 = vmatpush3.bf16.msra.mxu0 %v646_v25 }
  0x49   :  { %633 = vmatprep.subr.bf16.mxu1 %v632_v9  ;;  %648 = vmatprep.subr.bf16.mxu0 %v736_v16 }
  0x4c   :  { %635 = vmatpush3.bf16.msra.mxu1 %v634_v12  ;;  %650 = vmatpush3.bf16.msra.mxu0 %v649_v28 }
  0x4d   :  { %660 = vmatprep.subr.bf16.mxu1 %v736_v16  ;;  %651 = vmatprep.subr.bf16.mxu0 %v736_v16 }
  0x50   :  { %653 = vmatpush3.bf16.msra.mxu0 %v652_v31 }
  0x51   :  { %654 = vmatprep.subr.bf16.mxu0 %v736_v16 }
  0x54   :  { %656 = vmatpush3.bf16.msra.mxu0 %v655_v47 }
  0x55   :  { %657 = vmatprep.subr.bf16.mxu0 %v736_v16 }
  0x58   :  { %659 = vmatpush3.bf16.msra.mxu0 %v658_v50 }
 0x10e   :  { %v161_v39 = vpop.f32.mrb[0].mxu0 }
 0x10f   :  { %v162_v40 = vadd.f32 %v161_v39, %v84_v37  ;;  %v163_v41 = vpop.f32.mrb[1].mxu0 }
 0x110   :  { %v164_v42 = vadd.f32 %v163_v41, %v88_v38 }
 0x111   :  { %v166_v44 = vmax.f32 %v162_v40, 0.0 }
 0x112   :  { %v167_v43 = vmax.f32 %v164_v42, 0.0 }
 0x114   :  { %271 = vmatprep.mubr.f32.mxu1 %v167_v43 }
 0x115   :  { %272 = vmatmul.mubr.f32.vlgmr.msra.gmra.mrb[0].mxu1 %v166_v44 }
 0x116   :  { %585 = vmatprep.mubr.msk.f32.mxu1 %vm737_vm1, %v735_v0  ;;  %662 = vmatpush3.bf16.msra.mxu1 %v661_v54  ;;  %v469_v0 = vld [vmem:[%s993_s4] ss:$0 sm:$0xff] }
 0x117   :  { %663 = vmatprep.subr.bf16.mxu1 %v736_v16 }
 0x11a   :  { %665 = vmatpush3.bf16.msra.mxu1 %v664_v56 }
 0x11b   :  { %666 = vmatprep.subr.bf16.mxu1 %v736_v16 }
 0x11e   :  { %668 = vmatpush3.bf16.msra.mxu1 %v667_v59 }
 0x11f   :  { %669 = vmatprep.subr.bf16.mxu1 %v736_v16 }
 0x122   :  { %671 = vmatpush3.bf16.msra.mxu1 %v670_v4 }
 0x1e8   :  { %v505_v60 = vpop.f32.mrb[0].mxu1 }
 0x1e9   :  { %v506_v61 = vpop.f32.mrb[1].mxu1 }
 0x1ea   :  { %v507_v62 = vadd.f32 %v506_v61, %v505_v60 }
 0x1ec   :  { %v274_v63 = vadd.f32 %v507_v62, %v469_v0 }
 0x1ee   :  { %v277_v1 = vmax.f32 %v274_v63, 0.0 }
 0x1f0   :  { %567 = vmatmul.mubr.f32.vlgmr.msra.gmra.mrb[2].mxu0 %v277_v1 }
 0x2c3   :  { %v367_v6 = vpop.f32.mrb[2].mxu0 }
 0x2c4   :  { %v368_v7 = vadd.f32 %v470_v5, %v367_v6  ;;  %v568_v8 = vpop.f32.mrb[3].mxu0 }
 0x2c6   :  { %v371_v9 = vmax.f32 %v368_v7, 0.0 }
 0x2c8   :  { %586 = vmatmul.mubr.msk.f32.vlgmr.msra.gmra.mrb[2].mxu1 %vm387_vm2, %v371_v9 }
 0x39b   :  { %v457_v11 = vpop.f32.mrb[2].mxu1 }
 0x39c   :  { %v458_v12 = vadd.f32 %v471_v10, %v457_v11  ;;  %v587_v13 = vpop.f32.mrb[3].mxu1 }
 0x39e   :  { %461 = vst [vmem:[%s998_s9] sm:$0xff] %v458_v12 }
 0x39f   :  { %466 = vsyncpa [#allocation3], 1 }
 0x3a0   :  { %467 = vsyncpa [#allocation5], 1 }

</bundles_post_ra>
